<compile_context>
chip_gen: v6e
topology: v6e:2x2x1
jax: 0.10.0
libtpu: 0.0.40
codegen_flags: <defaults>
</compile_context>

<pallas_src>
import functools

import jax
import jax.numpy as jnp
import numpy as np
from jax.experimental import pallas as pl
from jax.experimental.pallas import tpu as pltpu


def _round_up(n, m):
    return ((n + m - 1) // m) * m


def _ffn_math(x, w1_ref, b1_ref, w2_ref, b2_ref):
    """Linear1 + ReLU (+ identity Dropout) + Linear2; bf16 MXU, f32 accumulate."""
    h = jnp.dot(x.astype(jnp.bfloat16), w1_ref[...],
                preferred_element_type=jnp.float32)
    h = jnp.maximum(h + b1_ref[...], 0.0)
    out = jnp.dot(h.astype(jnp.bfloat16), w2_ref[...],
                  preferred_element_type=jnp.float32)
    return out + b2_ref[...]


def _make_ffn_kernel(separate_residual, add_residual):
    if separate_residual:
        def kernel(x_ref, w1_ref, b1_ref, w2_ref, b2_ref, res_ref, o_ref):
            out = _ffn_math(x_ref[...], w1_ref, b1_ref, w2_ref, b2_ref)
            o_ref[...] = (res_ref[...].astype(jnp.float32) + out).astype(o_ref.dtype)
    else:
        def kernel(x_ref, w1_ref, b1_ref, w2_ref, b2_ref, o_ref):
            x = x_ref[...]
            out = _ffn_math(x, w1_ref, b1_ref, w2_ref, b2_ref)
            if add_residual:
                # residual is None in the module -> residual == x; reuse the tile
                # already in VMEM instead of DMA'ing x a second time.
                out = x.astype(jnp.float32) + out
            o_ref[...] = out.astype(o_ref.dtype)
    return kernel


def ffn_pallas(x, w1, b1, w2, b2, residual=None, *, add_residual=True, tm=256):
    """x: (..., E). w1: (E, F), b1: (F,), w2: (F, E), b2: (E,)."""
    *lead, E = x.shape
    F = w1.shape[1]
    M = int(np.prod(lead)) if lead else 1
    x2 = x.reshape(M, E)

    # Lane-dense padding: last dims to multiples of 128; token axis to tile size.
    Ep = _round_up(E, 128)
    Fp = _round_up(F, 128)
    tm_eff = max(8, min(tm, _round_up(M, 128)))   # don't over-pad tiny M
    Mp = _round_up(M, tm_eff)

    xp = jnp.pad(x2, ((0, Mp - M), (0, Ep - E)))
    # Weights in bf16 (MXU-native on v5e/v6e/v7x); biases stay f32 for the epilogue.
    w1p = jnp.pad(w1, ((0, Ep - E), (0, Fp - F))).astype(jnp.bfloat16)
    w2p = jnp.pad(w2, ((0, Fp - F), (0, Ep - E))).astype(jnp.bfloat16)
    b1p = jnp.pad(b1, (0, Fp - F)).astype(jnp.float32).reshape(1, Fp)
    b2p = jnp.pad(b2, (0, Ep - E)).astype(jnp.float32).reshape(1, Ep)

    separate_residual = add_residual and (residual is not None)
    kernel = _make_ffn_kernel(separate_residual, add_residual)

    # TODO(synk): for production-sized E/F (e.g. 1024/4096) the weight blocks no
    # longer fit comfortably in v7x's 64 MiB VMEM; tile the F (reduction) axis of
    # the second matmul with an accumulator + pl.when finalize instead of keeping
    # both weights fully resident.
    in_specs = [
        pl.BlockSpec((tm_eff, Ep), lambda i: (i, 0)),   # x tile
        pl.BlockSpec((Ep, Fp), lambda i: (0, 0)),       # w1 (resident)
        pl.BlockSpec((1, Fp), lambda i: (0, 0)),        # b1
        pl.BlockSpec((Fp, Ep), lambda i: (0, 0)),       # w2 (resident)
        pl.BlockSpec((1, Ep), lambda i: (0, 0)),        # b2
    ]
    args = [xp, w1p, b1p, w2p, b2p]
    if separate_residual:
        resp = jnp.pad(residual.reshape(M, E), ((0, Mp - M), (0, Ep - E)))
        in_specs.append(pl.BlockSpec((tm_eff, Ep), lambda i: (i, 0)))
        args.append(resp)

    out = pl.pallas_call(
        kernel,
        out_shape=jax.ShapeDtypeStruct((Mp, Ep), x.dtype),
        grid_spec=pltpu.PrefetchScalarGridSpec(
            num_scalar_prefetch=0,
            grid=(Mp // tm_eff,),
            in_specs=in_specs,
            out_specs=pl.BlockSpec((tm_eff, Ep), lambda i: (i, 0)),
        ),
        compiler_params=pltpu.CompilerParams(
            dimension_semantics=("parallel",)),   # shards token tiles across TCs on v7x
    )(*args)

    return out[:M, :E].reshape(x.shape)


def ffn_reference_bf16(x, w1, b1, w2, b2, residual=None, add_residual=True):
    """Reference mirroring the kernel's bf16-MXU / f32-accumulate math."""
    h = jnp.einsum("...e,ef->...f", x.astype(jnp.bfloat16),
                   w1.astype(jnp.bfloat16), preferred_element_type=jnp.float32)
    h = jnp.maximum(h + b1.astype(jnp.float32), 0.0)
    out = jnp.einsum("...f,fe->...e", h.astype(jnp.bfloat16),
                     w2.astype(jnp.bfloat16), preferred_element_type=jnp.float32)
    out = out + b2.astype(jnp.float32)
    if not add_residual:
        return out.astype(x.dtype)
    res = x if residual is None else residual
    return (res.astype(jnp.float32) + out).astype(x.dtype)


def ffn_reference_f32(x, w1, b1, w2, b2, residual=None, add_residual=True):
    """Full-precision reference matching the PyTorch module semantics."""
    h = jnp.maximum(jnp.einsum("...e,ef->...f", x, w1) + b1, 0.0)
    out = jnp.einsum("...f,fe->...e", h, w2) + b2
    if not add_residual:
        return out
    res = x if residual is None else residual
    return res + out


if __name__ == "__main__":
    # Module config: embed_dims=32, feedforward_channels=64, num_fcs=2,
    # dropout=0.0, add_residual=True  (Dropout at p=0 is identity).
    B, N, E, F = 2, 8, 32, 64

    key = jax.random.PRNGKey(0)
    kx, k1, k2, k3, k4 = jax.random.split(key, 5)

    x = jax.random.normal(kx, (B, N, E), dtype=jnp.float32)
    # Deterministic synthetic parameters (stored as (in, out), i.e. W.T of torch).
    w1 = jax.random.normal(k1, (E, F), dtype=jnp.float32) * 0.02
    b1 = jax.random.normal(k2, (F,), dtype=jnp.float32) * 0.02
    w2 = jax.random.normal(k3, (F, E), dtype=jnp.float32) * 0.02
    b2 = jax.random.normal(k4, (E,), dtype=jnp.float32) * 0.02

    out = ffn_pallas(x, w1, b1, w2, b2)           # residual=None -> residual = x
    out = jax.block_until_ready(out)

    # Tight check vs. a reference that uses the same bf16-MXU math.
    ref_bf16 = ffn_reference_bf16(x, w1, b1, w2, b2)
    np.testing.assert_allclose(np.asarray(out), np.asarray(ref_bf16),
                               rtol=1e-4, atol=1e-4)

    # Loose sanity check vs. the full-f32 module semantics (bf16 matmul error).
    ref_f32 = ffn_reference_f32(x, w1, b1, w2, b2)
    np.testing.assert_allclose(np.asarray(out), np.asarray(ref_f32),
                               rtol=5e-2, atol=5e-2)

    print("KERNEL_OK")
</pallas_src>

<mosaic_0001>
module attributes {stable_mosaic.version = 11 : i64} {
  func.func @kernel(%arg0: i32, %arg1: memref<128x128xf32, #tpu.memory_space<vmem>>, %arg2: memref<128x128xbf16, #tpu.memory_space<vmem>>, %arg3: memref<1x128xf32, #tpu.memory_space<vmem>>, %arg4: memref<128x128xbf16, #tpu.memory_space<vmem>>, %arg5: memref<1x128xf32, #tpu.memory_space<vmem>>, %arg6: memref<128x128xf32, #tpu.memory_space<vmem>>) attributes {dimension_semantics = [#tpu.dimension_semantics<parallel>], iteration_bounds = array<i64: 1>, scalar_prefetch = 0 : i64, scratch_operands = 0 : i64, tpu.core_type = #tpu.core_type<tc>, window_params = [{transform_indices = @transform_0, window_bounds = array<i64: 128, 128>}, {pipeline_mode = #tpu.pipeline_mode<synchronous>, transform_indices = @transform_1, window_bounds = array<i64: 128, 128>}, {pipeline_mode = #tpu.pipeline_mode<synchronous>, transform_indices = @transform_2, window_bounds = array<i64: 1, 128>}, {pipeline_mode = #tpu.pipeline_mode<synchronous>, transform_indices = @transform_3, window_bounds = array<i64: 128, 128>}, {pipeline_mode = #tpu.pipeline_mode<synchronous>, transform_indices = @transform_4, window_bounds = array<i64: 1, 128>}, {transform_indices = @transform_5, window_bounds = array<i64: 128, 128>}]} {
    %c0 = arith.constant 0 : index
    %c0_0 = arith.constant 0 : index
    %0 = vector.load %arg1[%c0, %c0_0] : memref<128x128xf32, #tpu.memory_space<vmem>>, vector<128x128xf32>
    %1 = arith.truncf %0 : vector<128x128xf32> to vector<128x128xbf16>
    %c0_1 = arith.constant 0 : index
    %c0_2 = arith.constant 0 : index
    %2 = vector.load %arg2[%c0_1, %c0_2] : memref<128x128xbf16, #tpu.memory_space<vmem>>, vector<128x128xbf16>
    %cst = arith.constant dense<0.000000e+00> : vector<128x128xf32>
    %3 = tpu.matmul %1, %2, %cst {dimension_numbers = #tpu.dot_dimension_numbers<[1], [0], [0], [1], [0, 0, 1, 1], [], []>} : vector<128x128xbf16>, vector<128x128xbf16>, vector<128x128xf32> -> vector<128x128xf32>
    %c0_3 = arith.constant 0 : index
    %c0_4 = arith.constant 0 : index
    %4 = vector.load %arg3[%c0_3, %c0_4] : memref<1x128xf32, #tpu.memory_space<vmem>>, vector<1x128xf32>
    %5 = vector.broadcast %4 : vector<1x128xf32> to vector<128x128xf32>
    %6 = arith.addf %3, %5 : vector<128x128xf32>
    %cst_5 = arith.constant 0.000000e+00 : f32
    %7 = vector.broadcast %cst_5 : f32 to vector<128x128xf32>
    %8 = arith.maximumf %6, %7 : vector<128x128xf32>
    %9 = arith.truncf %8 : vector<128x128xf32> to vector<128x128xbf16>
    %c0_6 = arith.constant 0 : index
    %c0_7 = arith.constant 0 : index
    %10 = vector.load %arg4[%c0_6, %c0_7] : memref<128x128xbf16, #tpu.memory_space<vmem>>, vector<128x128xbf16>
    %cst_8 = arith.constant dense<0.000000e+00> : vector<128x128xf32>
    %11 = tpu.matmul %9, %10, %cst_8 {dimension_numbers = #tpu.dot_dimension_numbers<[1], [0], [0], [1], [0, 0, 1, 1], [], []>} : vector<128x128xbf16>, vector<128x128xbf16>, vector<128x128xf32> -> vector<128x128xf32>
    %c0_9 = arith.constant 0 : index
    %c0_10 = arith.constant 0 : index
    %12 = vector.load %arg5[%c0_9, %c0_10] : memref<1x128xf32, #tpu.memory_space<vmem>>, vector<1x128xf32>
    %13 = vector.broadcast %12 : vector<1x128xf32> to vector<128x128xf32>
    %14 = arith.addf %11, %13 : vector<128x128xf32>
    %15 = arith.addf %0, %14 : vector<128x128xf32>
    %c0_11 = arith.constant 0 : index
    %c0_12 = arith.constant 0 : index
    %16 = vector.load %arg6[%c0_11, %c0_12] : memref<128x128xf32, #tpu.memory_space<vmem>>, vector<128x128xf32>
    tpu.vector_store %arg6[%c0_11, %c0_12], %15 {strides = array<i32>} : memref<128x128xf32, #tpu.memory_space<vmem>>, vector<128x128xf32>,
    return
  }
  func.func @transform_0(%arg0: i32) -> (i32, i32) {
    %c0_i32 = arith.constant 0 : i32
    %c0_i32_0 = arith.constant 0 : i32
    return %arg0, %c0_i32 : i32, i32
  }
  func.func @transform_1(%arg0: i32) -> (i32, i32) {
    %c0_i32 = arith.constant 0 : i32
    %c0_i32_0 = arith.constant 0 : i32
    %c0_i32_1 = arith.constant 0 : i32
    return %c0_i32, %c0_i32_0 : i32, i32
  }
  func.func @transform_2(%arg0: i32) -> (i32, i32) {
    %c0_i32 = arith.constant 0 : i32
    %c0_i32_0 = arith.constant 0 : i32
    %c0_i32_1 = arith.constant 0 : i32
    return %c0_i32, %c0_i32_0 : i32, i32
  }
  func.func @transform_3(%arg0: i32) -> (i32, i32) {
    %c0_i32 = arith.constant 0 : i32
    %c0_i32_0 = arith.constant 0 : i32
    %c0_i32_1 = arith.constant 0 : i32
    return %c0_i32, %c0_i32_0 : i32, i32
  }
  func.func @transform_4(%arg0: i32) -> (i32, i32) {
    %c0_i32 = arith.constant 0 : i32
    %c0_i32_0 = arith.constant 0 : i32
    %c0_i32_1 = arith.constant 0 : i32
    return %c0_i32, %c0_i32_0 : i32, i32
  }
  func.func @transform_5(%arg0: i32) -> (i32, i32) {
    %c0_i32 = arith.constant 0 : i32
    %c0_i32_0 = arith.constant 0 : i32
    return %arg0, %c0_i32 : i32, i32
  }
}

</mosaic_0001>

<bundles_post_ra>
// kernel: tpu_custom_call.1
= control target key start
LH: loop header
LB: loop body
LE: loop exit
PB: predicated region body
PF: predicated region fallthrough
CT: control target
= control target key end

     0   :  { %10 = vsyncpa [#allocation3], 0  ;;  %s865_s0 = inlined_call_operand.hbm [shape: f32[128,128], index: 0, kind: input, shape index: {}]   ;;  %s866_s1 = inlined_call_operand.hbm [shape: bf16[128,128], index: 1, kind: input, shape index: {}]   ;;  %s867_s2 = inlined_call_operand.vmem [shape: f32[1,128], index: 2, kind: input, shape index: {}]   ;;  %s868_s3 = inlined_call_operand.hbm [shape: bf16[128,128], index: 3, kind: input, shape index: {}]   ;;  %s869_s4 = inlined_call_operand.vmem [shape: f32[1,128], index: 4, kind: input, shape index: {}]   ;;  %s870_s5 = inlined_call_operand.hbm [shape: f32[128,128], index: 5, kind: output, shape index: {}]  }
   0x1   :  { %11 = vsyncpa [#allocation6], 0 }
   0x2   :  { %12 = vsyncpa [#allocation4], 0  ;;  %s721_s18 = smov [#allocation5]  }
   0x3   :  { %s30_s19 = sshll.u32 %s721_s18, 4  ;;  %s31_s19 = int_to_ptr.vmem [resolvable:$true] %s30_s19 }
   0x4   :  { %s643_s20 = scalar_lea.vmem %s31_s19, 1024  ;;  %p648_p1 = scmp.lt.s32.totalorder %s31_s19, %s31_s19 }
   0x5   :  { %p644_p0 = scmp.ne.s32.totalorder %s31_s19, %s643_s20  ;;  %p649_p2 = scmp.lt.s32.totalorder %s643_s20, %s643_s20 }
   0x7   :  { %p650_p3 = por %p649_p2, %p648_p1 }
   0x9   :  { %p651_p4 = pnand %p650_p3, %p644_p0 }
   0xb   :  { %654 = shalt.err (!%p651_p4)
}
   0xc   :  { %s722_s21 = smov 64   ;;  %s723_s22 = smov 4  }
   0xd   :  { %36 = dma.hbm_to_vmem [thread:$0]  %s866_s1, 1024, %s31_s19, [#allocation6], %s722_s21, %s722_s21, %s723_s22  }
   0xe   :  { %s724_s25 = smov [#allocation2]  }
   0xf   :  { %s18_s26 = sshll.u32 %s724_s25, 4  ;;  %s19_s26 = int_to_ptr.vmem [resolvable:$true] %s18_s26 }
  0x10   :  { %s663_s27 = scalar_lea.vmem %s19_s26, 2048  ;;  %p668_p6 = scmp.lt.s32.totalorder %s19_s26, %s19_s26 }
  0x11   :  { %p664_p5 = scmp.ne.s32.totalorder %s19_s26, %s663_s27  ;;  %p669_p7 = scmp.lt.s32.totalorder %s663_s27, %s663_s27 }
  0x13   :  { %p670_p8 = por %p669_p7, %p668_p6 }
  0x15   :  { %p671_p9 = pnand %p670_p8, %p664_p5 }
  0x17   :  { %674 = shalt.err (!%p671_p9)
}
  0x18   :  { %s725_s28 = smov 128   ;;  %s726_s29 = smov 8  }
  0x19   :  { %24 = dma.hbm_to_vmem [thread:$0]  %s865_s0, 2048, %s19_s26, [#allocation3], %s725_s28, %s725_s28, %s726_s29  }
  0x1a   :  { %s727_s1 = smov [#allocation7]  }
  0x1b   :  { %s44_s7 = sshll.u32 %s727_s1, 4  ;;  %s45_s7 = int_to_ptr.vmem [resolvable:$true] %s44_s7 }
  0x1c   :  { %s683_s8 = scalar_lea.vmem %s45_s7, 1024  ;;  %p688_p11 = scmp.lt.s32.totalorder %s45_s7, %s45_s7 }
  0x1d   :  { %p684_p10 = scmp.ne.s32.totalorder %s45_s7, %s683_s8  ;;  %p689_p12 = scmp.lt.s32.totalorder %s683_s8, %s683_s8 }
  0x1f   :  { %p690_p13 = por %p689_p12, %p688_p11 }
  0x21   :  { %p691_p0 = pnand %p690_p13, %p684_p10 }
  0x23   :  { %694 = shalt.err (!%p691_p0)
}
  0x24   :  { %50 = dma.hbm_to_vmem [thread:$0]  %s868_s3, 1024, %s45_s7, [#allocation6], %s722_s21, %s722_s21, %s723_s22  }
  0x25   :  { %715 = dma.done.wait [#allocation3], 2048  }
  0x26   :  { %716 = vsyncadd [#allocation3], 4294965248 }
  0x27   :  { %717 = dma.done.wait [#allocation6], 2048  }
  0x28   :  { %718 = vsyncadd [#allocation6], 4294965248  ;;  %v619_v0 = vld [vmem:[#allocation5 + $0x38] sm:$0xff]   ;;  %v620_v1 = vld [vmem:[#allocation5 + $0x30] sm:$0xff]  }
  0x29   :  { %547 = vmatprep.subr.bf16.mxu0 %v619_v0  ;;  %v621_v2 = vld [vmem:[#allocation5 + $0x28] sm:$0xff]   ;;  %v622_v3 = vld [vmem:[#allocation5 + $0x20] sm:$0xff]   ;;  %v623_v7 = vld [vmem:[#allocation5 + $0x18] sm:$0xff]  }
  0x2a   :  { %548 = vmatpush3.bf16.msra.mxu0 %v619_v0  ;;  %v771_v4 = vld [vmem:[#allocation2] sm:$0xff]  ;;  %v773_v5 = vld [vmem:[#allocation2 + $0x8] sm:$0xff]  ;;  %v627_v8 = vld [vmem:[#allocation7 + $0x38] sm:$0xff]  }
  0x2b   :  { %549 = vmatprep.subr.bf16.mxu0 %v620_v1  ;;  %v79_v6 = vpack.c.bf16 %v773_v5, %v771_v4  ;;  %v628_v9 = vld [vmem:[#allocation7 + $0x30] sm:$0xff]   ;;  %579 = vmatprep.subr.bf16.mxu1 %v627_v8  ;;  %v629_v11 = vld [vmem:[#allocation7 + $0x28] sm:$0xff]   ;;  %v630_v13 = vld [vmem:[#allocation7 + $0x20] sm:$0xff]  }
  0x2c   :  { %v624_v10 = vld [vmem:[#allocation5 + $0x10] sm:$0xff]   ;;  %580 = vmatpush3.bf16.msra.mxu1 %v627_v8  ;;  %v625_v12 = vld [vmem:[#allocation5 + $0x8] sm:$0xff]   ;;  %v626_v14 = vld [vmem:[#allocation5] sm:$0xff]  }
  0x2d   :  { %563 = vmatprep.mubr.bf16.mxu0 %v79_v6  ;;  %581 = vmatprep.subr.bf16.mxu1 %v628_v9  ;;  %v631_v15 = vld [vmem:[#allocation7 + $0x18] sm:$0xff]   ;;  %v777_v16 = vld [vmem:[#allocation2 + $0x10] sm:$0xff]  ;;  %v781_v18 = vld [vmem:[#allocation2 + $0x20] sm:$0xff] }
  0x2e   :  { %550 = vmatpush3.bf16.msra.mxu0 %v620_v1  ;;  %v779_v17 = vld [vmem:[#allocation2 + $0x18] sm:$0xff]  ;;  %v783_v19 = vld [vmem:[#allocation2 + $0x28] sm:$0xff]  ;;  %v789_v22 = vld [vmem:[#allocation2 + $0x30] sm:$0xff] }
  0x2f   :  { %551 = vmatprep.subr.bf16.mxu0 %v621_v2  ;;  %v80_v20 = vpack.c.bf16 %v779_v17, %v777_v16  ;;  %v81_v21 = vpack.c.bf16 %v783_v19, %v781_v18  ;;  %v791_v23 = vld [vmem:[#allocation2 + $0x38] sm:$0xff]  ;;  %v793_v24 = vld [vmem:[#allocation2 + $0x40] sm:$0xff]  ;;  %v795_v25 = vld [vmem:[#allocation2 + $0x48] sm:$0xff] }
  0x30   :  { %582 = vmatpush3.bf16.msra.mxu1 %v628_v9  ;;  %v82_v26 = vpack.c.bf16 %v791_v23, %v789_v22  ;;  %v83_v27 = vpack.c.bf16 %v795_v25, %v793_v24  ;;  %v801_v28 = vld [vmem:[#allocation2 + $0x50] sm:$0xff]  ;;  %v803_v29 = vld [vmem:[#allocation2 + $0x58] sm:$0xff]  ;;  %v805_v30 = vld [vmem:[#allocation2 + $0x60] sm:$0xff] }
  0x31   :  { %583 = vmatprep.subr.bf16.mxu1 %v629_v11  ;;  %v807_v31 = vld [vmem:[#allocation2 + $0x68] sm:$0xff]  ;;  %v84_v32 = vpack.c.bf16 %v803_v29, %v801_v28  ;;  %v813_v34 = vld [vmem:[#allocation2 + $0x70] sm:$0xff]  ;;  %v815_v35 = vld [vmem:[#allocation2 + $0x78] sm:$0xff] }
  0x32   :  { %552 = vmatpush3.bf16.msra.mxu0 %v621_v2  ;;  %v85_v33 = vpack.c.bf16 %v807_v31, %v805_v30  ;;  %v86_v36 = vpack.c.bf16 %v815_v35, %v813_v34  ;;  %v632_v37 = vld [vmem:[#allocation7 + $0x10] sm:$0xff]   ;;  %v633_v38 = vld [vmem:[#allocation7 + $0x8] sm:$0xff]   ;;  %v634_v39 = vld [vmem:[#allocation7] sm:$0xff]  }
  0x33   :  { %553 = vmatprep.subr.bf16.mxu0 %v622_v3  ;;  %v497_v42 = vld [vmem:[%s867_s2] ss:$0 sm:$0xff] }
  0x34   :  { %584 = vmatpush3.bf16.msra.mxu1 %v629_v11 }
  0x35   :  { %585 = vmatprep.subr.bf16.mxu1 %v630_v13 }
  0x36   :  { %554 = vmatpush3.bf16.msra.mxu0 %v622_v3 }
  0x37   :  { %555 = vmatprep.subr.bf16.mxu0 %v623_v7 }
  0x38   :  { %586 = vmatpush3.bf16.msra.mxu1 %v630_v13 }
  0x39   :  { %587 = vmatprep.subr.bf16.mxu1 %v631_v15 }
  0x3a   :  { %556 = vmatpush3.bf16.msra.mxu0 %v623_v7 }
  0x3b   :  { %557 = vmatprep.subr.bf16.mxu0 %v624_v10 }
  0x3c   :  { %588 = vmatpush3.bf16.msra.mxu1 %v631_v15 }
  0x3d   :  { %589 = vmatprep.subr.bf16.mxu1 %v632_v37 }
  0x3e   :  { %558 = vmatpush3.bf16.msra.mxu0 %v624_v10 }
  0x3f   :  { %559 = vmatprep.subr.bf16.mxu0 %v625_v12 }
  0x40   :  { %590 = vmatpush3.bf16.msra.mxu1 %v632_v37 }
  0x41   :  { %591 = vmatprep.subr.bf16.mxu1 %v633_v38 }
  0x42   :  { %560 = vmatpush3.bf16.msra.mxu0 %v625_v12 }
  0x43   :  { %561 = vmatprep.subr.bf16.mxu0 %v626_v14 }
  0x44   :  { %592 = vmatpush3.bf16.msra.mxu1 %v633_v38 }
  0x45   :  { %593 = vmatprep.subr.bf16.mxu1 %v634_v39 }
  0x46   :  { %562 = vmatpush3.bf16.msra.mxu0 %v626_v14 }
  0x48   :  { %594 = vmatpush3.bf16.msra.mxu1 %v634_v39 }
  0x49   :  { %564 = vmatmul.mubr.bf16.vlgmr.msra.gmra.mxu0 %v80_v20 }
  0x4a   :  { %567 = vmatprep.mubr.bf16.mxu0 %v81_v21 }
  0x51   :  { %568 = vmatmul.mubr.bf16.gmra.mxu0 %v82_v26 }
  0x52   :  { %571 = vmatprep.mubr.bf16.mxu0 %v83_v27 }
  0x59   :  { %572 = vmatmul.mubr.bf16.gmra.mxu0 %v84_v32 }
  0x5a   :  { %575 = vmatprep.mubr.bf16.mxu0 %v85_v33 }
  0x61   :  { %576 = vmatmul.mubr.bf16.gmra.mxu0 %v86_v36 }
 0x109   :  { %v565_v40 = vpop.f32.mrf.mxu0 }
 0x10a   :  { %v201_v46 = vadd.f32 %v565_v40, %v497_v42 }
 0x10b   :  { %v192_v41 = vpop.f32.mrf.mxu0 }
 0x10c   :  { %v193_v44 = vadd.f32 %v497_v42, %v192_v41  ;;  %v257_v53 = vmax.f32 %v201_v46, 0.0 }
 0x10d   :  { %v566_v43 = vpop.f32.mrf.mxu0 }
 0x10e   :  { %v204_v45 = vadd.f32 %v566_v43, %v497_v42  ;;  %v255_v51 = vmax.f32 %v193_v44, 0.0 }
 0x10f   :  { %v195_v47 = vpop.f32.mrf.mxu0 }
 0x110   :  { %v196_v48 = vadd.f32 %v497_v42, %v195_v47  ;;  %v258_v49 = vmax.f32 %v204_v45, 0.0 }
 0x111   :  { %v569_v50 = vpop.f32.mrf.mxu0 }
 0x112   :  { %v256_v52 = vmax.f32 %v196_v48, 0.0  ;;  %v272_v56 = vpack.c.bf16 %v258_v49, %v257_v53  ;;  %v217_v60 = vadd.f32 %v569_v50, %v497_v42  ;;  %v825_v50 = vld [vmem:[%s869_s4] ss:$0 sm:$0xff]  ;;  %s728_s4 = smov [#allocation8]  }
 0x113   :  { %v208_v54 = vpop.f32.mrf.mxu0  ;;  %s484_s12 = sshll.u32 %s728_s4, 4  ;;  %s485_s12 = int_to_ptr.vmem [resolvable:$true] %s484_s12 }
 0x114   :  { %v271_v55 = vpack.c.bf16 %v256_v52, %v255_v51  ;;  %v209_v58 = vadd.f32 %v497_v42, %v208_v54  ;;  %v261_v3 = vmax.f32 %v217_v60, 0.0  ;;  %s695_s13 = scalar_lea.vmem %s485_s12, 2048  ;;  %p700_p2 = scmp.lt.s32.totalorder %s485_s12, %s485_s12 }
 0x115   :  { %v570_v57 = vpop.f32.mrf.mxu0  ;;  %p696_p1 = scmp.ne.s32.totalorder %s485_s12, %s695_s13  ;;  %p701_p3 = scmp.lt.s32.totalorder %s695_s13, %s695_s13 }
 0x116   :  { %v220_v59 = vadd.f32 %v570_v57, %v497_v42  ;;  %595 = vmatprep.mubr.bf16.mxu1 %v271_v55  ;;  %v259_v1 = vmax.f32 %v209_v58, 0.0 }
 0x117   :  { %v211_v61 = vpop.f32.mrf.mxu0  ;;  %596 = vmatmul.mubr.bf16.vlgmr.msra.gmra.mxu1 %v272_v56  ;;  %p702_p4 = por %p701_p3, %p700_p2 }
 0x118   :  { %v212_v62 = vadd.f32 %v497_v42, %v211_v61  ;;  %v262_v63 = vmax.f32 %v220_v59, 0.0 }
 0x119   :  { %v573_v0 = vpop.f32.mrf.mxu0  ;;  %p703_p5 = pnand %p702_p4, %p696_p1 }
 0x11a   :  { %v260_v2 = vmax.f32 %v212_v62, 0.0  ;;  %v274_v8 = vpack.c.bf16 %v262_v63, %v261_v3  ;;  %v233_v12 = vadd.f32 %v573_v0, %v497_v42 }
 0x11b   :  { %v224_v6 = vpop.f32.mrf.mxu0 }
 0x11c   :  { %v273_v7 = vpack.c.bf16 %v260_v2, %v259_v1  ;;  %v225_v10 = vadd.f32 %v497_v42, %v224_v6  ;;  %v265_v27 = vmax.f32 %v233_v12, 0.0 }
 0x11d   :  { %v574_v9 = vpop.f32.mrf.mxu0 }
 0x11e   :  { %v236_v11 = vadd.f32 %v574_v9, %v497_v42  ;;  %599 = vmatprep.mubr.bf16.mxu1 %v273_v7  ;;  %v263_v21 = vmax.f32 %v225_v10, 0.0 }
 0x11f   :  { %v227_v13 = vpop.f32.mrf.mxu0  ;;  %600 = vmatmul.mubr.bf16.gmra.mxu1 %v274_v8 }
 0x120   :  { %v228_v14 = vadd.f32 %v497_v42, %v227_v13  ;;  %v266_v15 = vmax.f32 %v236_v11, 0.0 }
 0x121   :  { %v577_v20 = vpop.f32.mrf.mxu0 }
 0x122   :  { %v264_v26 = vmax.f32 %v228_v14, 0.0  ;;  %v276_v36 = vpack.c.bf16 %v266_v15, %v265_v27  ;;  %v249_v40 = vadd.f32 %v577_v20, %v497_v42 }
 0x123   :  { %v240_v32 = vpop.f32.mrf.mxu0 }
 0x124   :  { %v275_v33 = vpack.c.bf16 %v264_v26, %v263_v21  ;;  %v241_v38 = vadd.f32 %v497_v42, %v240_v32  ;;  %v269_v47 = vmax.f32 %v249_v40, 0.0 }
 0x125   :  { %v578_v37 = vpop.f32.mrf.mxu0 }
 0x126   :  { %v252_v39 = vadd.f32 %v578_v37, %v497_v42  ;;  %603 = vmatprep.mubr.bf16.mxu1 %v275_v33  ;;  %v267_v45 = vmax.f32 %v241_v38, 0.0 }
 0x127   :  { %v243_v41 = vpop.f32.mrf.mxu0  ;;  %604 = vmatmul.mubr.bf16.gmra.mxu1 %v276_v36 }
 0x128   :  { %v244_v43 = vadd.f32 %v497_v42, %v243_v41  ;;  %v270_v44 = vmax.f32 %v252_v39, 0.0 }
 0x12a   :  { %v268_v46 = vmax.f32 %v244_v43, 0.0  ;;  %v278_v49 = vpack.c.bf16 %v270_v44, %v269_v47 }
 0x12c   :  { %v277_v48 = vpack.c.bf16 %v268_v46, %v267_v45 }
 0x12e   :  { %607 = vmatprep.mubr.bf16.mxu1 %v277_v48 }
 0x12f   :  { %608 = vmatmul.mubr.bf16.gmra.mxu1 %v278_v49 }
 0x1d7   :  { %v597_v51 = vpop.f32.mrf.mxu1 }
 0x1d8   :  { %v393_v52 = vadd.f32 %v597_v51, %v825_v50 }
 0x1d9   :  { %v384_v53 = vpop.f32.mrf.mxu1 }
 0x1da   :  { %v449_v54 = vadd.f32 %v393_v52, %v777_v16  ;;  %v385_v42 = vadd.f32 %v825_v50, %v384_v53 }
 0x1db   :  { %v598_v55 = vpop.f32.mrf.mxu1 }
 0x1dc   :  { %465 = vst [vmem:[#allocation8 + $0x10] sm:$0xff] %v449_v54  ;;  %v447_v56 = vadd.f32 %v385_v42, %v771_v4  ;;  %v396_v57 = vadd.f32 %v598_v55, %v825_v50 }
 0x1dd   :  { %v387_v58 = vpop.f32.mrf.mxu1 }
 0x1de   :  { %463 = vst [vmem:[#allocation8] sm:$0xff] %v447_v56  ;;  %v450_v59 = vadd.f32 %v396_v57, %v779_v17  ;;  %v388_v60 = vadd.f32 %v825_v50, %v387_v58 }
 0x1df   :  { %v601_v61 = vpop.f32.mrf.mxu1 }
 0x1e0   :  { %466 = vst [vmem:[#allocation8 + $0x18] sm:$0xff] %v450_v59  ;;  %v448_v62 = vadd.f32 %v388_v60, %v773_v5  ;;  %v409_v16 = vadd.f32 %v601_v61, %v825_v50 }
 0x1e1   :  { %v400_v63 = vpop.f32.mrf.mxu1 }
 0x1e2   :  { %464 = vst [vmem:[#allocation8 + $0x8] sm:$0xff] %v448_v62  ;;  %v453_v0 = vadd.f32 %v409_v16, %v789_v22  ;;  %v401_v4 = vadd.f32 %v825_v50, %v400_v63 }
 0x1e3   :  { %v602_v1 = vpop.f32.mrf.mxu1 }
 0x1e4   :  { %469 = vst [vmem:[#allocation8 + $0x30] sm:$0xff] %v453_v0  ;;  %v451_v2 = vadd.f32 %v401_v4, %v781_v18  ;;  %v412_v17 = vadd.f32 %v602_v1, %v825_v50 }
 0x1e5   :  { %v403_v3 = vpop.f32.mrf.mxu1 }
 0x1e6   :  { %467 = vst [vmem:[#allocation8 + $0x20] sm:$0xff] %v451_v2  ;;  %v454_v6 = vadd.f32 %v412_v17, %v791_v23  ;;  %v404_v5 = vadd.f32 %v825_v50, %v403_v3 }
 0x1e7   :  { %v605_v7 = vpop.f32.mrf.mxu1 }
 0x1e8   :  { %470 = vst [vmem:[#allocation8 + $0x38] sm:$0xff] %v454_v6  ;;  %v452_v8 = vadd.f32 %v404_v5, %v783_v19  ;;  %v425_v22 = vadd.f32 %v605_v7, %v825_v50 }
 0x1e9   :  { %v416_v9 = vpop.f32.mrf.mxu1 }
 0x1ea   :  { %468 = vst [vmem:[#allocation8 + $0x28] sm:$0xff] %v452_v8  ;;  %v457_v10 = vadd.f32 %v425_v22, %v801_v28  ;;  %v417_v18 = vadd.f32 %v825_v50, %v416_v9 }
 0x1eb   :  { %v606_v11 = vpop.f32.mrf.mxu1 }
 0x1ec   :  { %473 = vst [vmem:[#allocation8 + $0x50] sm:$0xff] %v457_v10  ;;  %v455_v12 = vadd.f32 %v417_v18, %v793_v24  ;;  %v428_v23 = vadd.f32 %v606_v11, %v825_v50 }
 0x1ed   :  { %v419_v13 = vpop.f32.mrf.mxu1 }
 0x1ee   :  { %471 = vst [vmem:[#allocation8 + $0x40] sm:$0xff] %v455_v12  ;;  %v458_v14 = vadd.f32 %v428_v23, %v803_v29  ;;  %v420_v19 = vadd.f32 %v825_v50, %v419_v13 }
 0x1ef   :  { %v609_v15 = vpop.f32.mrf.mxu1 }
 0x1f0   :  { %474 = vst [vmem:[#allocation8 + $0x58] sm:$0xff] %v458_v14  ;;  %v456_v20 = vadd.f32 %v420_v19, %v795_v25  ;;  %v441_v28 = vadd.f32 %v609_v15, %v825_v50 }
 0x1f1   :  { %v432_v21 = vpop.f32.mrf.mxu1 }
 0x1f2   :  { %472 = vst [vmem:[#allocation8 + $0x48] sm:$0xff] %v456_v20  ;;  %v461_v26 = vadd.f32 %v441_v28, %v813_v34  ;;  %v433_v24 = vadd.f32 %v825_v50, %v432_v21 }
 0x1f3   :  { %v610_v27 = vpop.f32.mrf.mxu1 }
 0x1f4   :  { %477 = vst [vmem:[#allocation8 + $0x70] sm:$0xff] %v461_v26  ;;  %v459_v32 = vadd.f32 %v433_v24, %v805_v30  ;;  %v444_v29 = vadd.f32 %v610_v27, %v825_v50 }
 0x1f5   :  { %v435_v33 = vpop.f32.mrf.mxu1 }
 0x1f6   :  { %475 = vst [vmem:[#allocation8 + $0x60] sm:$0xff] %v459_v32  ;;  %v462_v25 = vadd.f32 %v444_v29, %v815_v35  ;;  %v436_v36 = vadd.f32 %v825_v50, %v435_v33 }
 0x1f8   :  { %478 = vst [vmem:[#allocation8 + $0x78] sm:$0xff] %v462_v25  ;;  %v460_v37 = vadd.f32 %v436_v36, %v807_v31 }
 0x1fa   :  { %476 = vst [vmem:[#allocation8 + $0x68] sm:$0xff] %v460_v37 }
 0x1fb   :  { %706 = shalt.err (!%p703_p5)
}
 0x1fc   :  { %490 = dma.vmem_to_hbm [thread:$0]  %s485_s12, 2048, %s870_s5, [#allocation4], %s725_s28, %s725_s28, %s726_s29  }
 0x1fd   :  { %719 = dma.done.wait [#allocation4], 2048  }
 0x1fe   :  { %720 = vsyncadd [#allocation4], 4294965248 }
 0x1ff   :  { %494 = vsyncpa [#allocation3], 1 }
 0x200   :  { %495 = vsyncpa [#allocation6], 1 }
 0x201   :  { %496 = vsyncpa [#allocation4], 1 }

</bundles_post_ra>
